<compile_context>
chip_gen: v5e
topology: v5e:2x2
jax: 0.10.0
libtpu: 0.0.40
codegen_flags: <defaults>
</compile_context>

<pallas_src>
import jax
import jax.numpy as jnp
from jax.experimental import pallas as pl
from jax.experimental.pallas import tpu as pltpu


_VPU_C_MAX = 32  # below this, do the CxC contraction as VPU broadcast FMAs


def _choose_tiling(B, C, S, itemsize):
    """Pick (ts, bblk): lane-slab width and batch block.

    ts is a multiple of 128 (or the full S when S <= 128); per-image f32
    temporaries (~4 arrays of (C, ts)) are kept small enough to avoid spills.
    bblk amortizes the per-grid-step overhead over ~1 MiB of input per step.
    """
    if S <= 128:
        ts = S  # full-extent last dim is always a legal block dim
    else:
        max_ts_vreg = max(128, ((8192 // max(C, 1)) // 128) * 128)
        ts = min(2048, (S // 128) * 128, max_ts_vreg)
        ts = max(128, ts)

    target = 1 << 20  # ~1 MiB of input per grid step
    per_image = C * ts * itemsize
    bblk = max(1, min(B, target // max(per_image, 1)))

    # v7x has 2 TensorCores: keep >= 2 parallel grid steps whenever possible.
    def n_steps(bb, t):
        return (-(-B // bb)) * (-(-S // t))

    while n_steps(bblk, ts) < 2 and bblk > 1:
        bblk = max(1, bblk // 2)
    if n_steps(bblk, ts) < 2 and ts > 128:
        ts = max(128, ((ts // 2) // 128) * 128)
    return ts, bblk


def glu_kernel(x_ref, w_ref, b_ref, o_ref):
    # x_ref: (Bblk, C, TS)  NCHW-layout tile (channels on sublanes, spatial on lanes)
    # w_ref: (C, C)         PyTorch Linear weight (out, in), used as W @ x_tile
    # b_ref: (C, 1)         bias column
    # o_ref: (Bblk, C, TS)  output tile (same layout -> no wrapper permutes)
    bblk, C, _ = x_ref.shape
    in_dtype = x_ref.dtype
    use_vpu = C <= _VPU_C_MAX

    # Hoisted once per grid step (tiny: CxC and Cx1).
    bf = b_ref[...].astype(jnp.float32)                       # (C, 1)
    wf = w_ref[...].astype(jnp.float32) if use_vpu else None  # VPU path weight
    wd = None if use_vpu else w_ref[...].astype(in_dtype)     # MXU path weight

    half = jnp.asarray(0.5, in_dtype)
    one = jnp.asarray(1.0, in_dtype)

    def one_image(i):
        xi = x_ref[i]  # (C, TS), kept in the input dtype (no whole-tile upcast)
        if use_vpu:
            # C broadcast FMAs on the VPU; f32 accumulation seeded with the bias.
            acc = bf + wf[:, 0:1] * xi[0:1, :].astype(jnp.float32)
            for c in range(1, C):  # static, fully unrolled (C <= 32)
                acc = acc + wf[:, c:c + 1] * xi[c:c + 1, :].astype(jnp.float32)
            lin = acc
        else:
            lin = jnp.dot(wd, xi, preferred_element_type=jnp.float32) + bf
        # sigmoid(x) = 0.5 * (tanh(x/2) + 1): single EUP op, overlaps with FMAs/DMA.
        sig = half * (jnp.tanh(xi * half) + one)
        o_ref[i] = (lin * sig).astype(o_ref.dtype)

    if bblk == 1:
        one_image(0)
    else:
        # fori_loop (not a Python for) so only one image's temporaries are live.
        def body(i, carry):
            one_image(i)
            return carry

        jax.lax.fori_loop(0, bblk, body, 0)


def glu_pallas(x_nchw, weight, bias, *, ts=None, bblk=None):
    """x_nchw: (B, C, H, W); weight: (C, C) [PyTorch (out, in)]; bias: (C,)."""
    B, C, H, W = x_nchw.shape
    S = H * W
    itemsize = jnp.dtype(x_nchw.dtype).itemsize

    # Free reshape: (B, C, H, W) -> (B, C, S).  No pad, no HBM transpose.
    x3 = x_nchw.reshape(B, C, S)
    b2 = bias.reshape(C, 1)

    ts_auto, bblk_auto = _choose_tiling(B, C, S, itemsize)
    ts = ts_auto if ts is None else ts
    bblk = bblk_auto if bblk is None else bblk

    n_b = pl.cdiv(B, bblk)
    n_s = pl.cdiv(S, ts)

    cost = pl.CostEstimate(
        flops=2 * B * S * C * C + 4 * B * S * C,
        transcendentals=B * S * C,  # one tanh per element
        bytes_accessed=2 * B * S * C * itemsize + (C * C + C) * itemsize,
    )

    out3 = pl.pallas_call(
        glu_kernel,
        out_shape=jax.ShapeDtypeStruct((B, C, S), x_nchw.dtype),
        grid_spec=pltpu.PrefetchScalarGridSpec(
            num_scalar_prefetch=0,
            grid=(n_b, n_s),
            in_specs=[
                pl.BlockSpec((bblk, C, ts), lambda b, s: (b, 0, s)),  # x tile
                pl.BlockSpec((C, C), lambda b, s: (0, 0)),            # weight (resident)
                pl.BlockSpec((C, 1), lambda b, s: (0, 0)),            # bias (resident)
            ],
            out_specs=pl.BlockSpec((bblk, C, ts), lambda b, s: (b, 0, s)),
        ),
        compiler_params=pltpu.CompilerParams(
            dimension_semantics=("parallel", "parallel"),
            vmem_limit_bytes=48 * 1024 * 1024,  # safe on v5e/v6e/v7x
        ),
        cost_estimate=cost,
    )(x3, weight, b2)

    return out3.reshape(B, C, H, W)


if __name__ == "__main__":
    key = jax.random.PRNGKey(0)
    kx, kw, kb = jax.random.split(key, 3)

    B, C, H, W = 2, 4, 16, 16
    x = jax.random.normal(kx, (B, C, H, W), dtype=jnp.float32)

    # Deterministic parameter init (mimics nn.Linear's uniform(-1/sqrt(in), 1/sqrt(in)))
    bound = 1.0 / jnp.sqrt(jnp.float32(C))
    weight = jax.random.uniform(kw, (C, C), minval=-bound, maxval=bound, dtype=jnp.float32)
    bias = jax.random.uniform(kb, (C,), minval=-bound, maxval=bound, dtype=jnp.float32)

    out = glu_pallas(x, weight, bias)
    out = jax.block_until_ready(out)

    # Pure-JAX reference (identical math to the PyTorch module)
    lin_ref = jnp.einsum("bchw,oc->bohw", x, weight) + bias[None, :, None, None]
    ref = lin_ref * jax.nn.sigmoid(x)
    assert out.shape == (B, C, H, W)
    assert jnp.allclose(out, ref, atol=1e-5, rtol=1e-5)

    print("KERNEL_OK")
</pallas_src>

<mosaic_0001>
module attributes {stable_mosaic.version = 11 : i64} {
  func.func @glu_kernel(%arg0: i32, %arg1: i32, %arg2: memref<1x4x256xf32, #tpu.memory_space<vmem>>, %arg3: memref<4x4xf32, #tpu.memory_space<vmem>>, %arg4: memref<4x1xf32, #tpu.memory_space<vmem>>, %arg5: memref<1x4x256xf32, #tpu.memory_space<vmem>>) attributes {dimension_semantics = [#tpu.dimension_semantics<parallel>, #tpu.dimension_semantics<parallel>], iteration_bounds = array<i64: 2, 1>, scalar_prefetch = 0 : i64, scratch_operands = 0 : i64, tpu.core_type = #tpu.core_type<tc>, window_params = [{transform_indices = @transform_0, window_bounds = array<i64: 1, 4, 256>}, {pipeline_mode = #tpu.pipeline_mode<synchronous>, transform_indices = @transform_1, window_bounds = array<i64: 4, 4>}, {pipeline_mode = #tpu.pipeline_mode<synchronous>, transform_indices = @transform_2, window_bounds = array<i64: 4, 1>}, {transform_indices = @transform_3, window_bounds = array<i64: 1, 4, 256>}]} {
    %c0 = arith.constant 0 : index
    %c0_0 = arith.constant 0 : index
    %0 = vector.load %arg4[%c0, %c0_0] : memref<4x1xf32, #tpu.memory_space<vmem>>, vector<4x1xf32>
    %c0_1 = arith.constant 0 : index
    %c0_2 = arith.constant 0 : index
    %1 = vector.load %arg3[%c0_1, %c0_2] : memref<4x4xf32, #tpu.memory_space<vmem>>, vector<4x4xf32>
    %c0_3 = arith.constant 0 : index
    %c0_4 = arith.constant 0 : index
    %c0_5 = arith.constant 0 : index
    %2 = vector.load %arg2[%c0_3, %c0_4, %c0_5] : memref<1x4x256xf32, #tpu.memory_space<vmem>>, vector<1x4x256xf32>
    %3 = vector.shape_cast %2 : vector<1x4x256xf32> to vector<4x256xf32>
    %4 = vector.extract_strided_slice %1 {offsets = [0, 0], sizes = [4, 1], strides = [1, 1]} : vector<4x4xf32> to vector<4x1xf32>
    %5 = vector.extract_strided_slice %3 {offsets = [0, 0], sizes = [1, 256], strides = [1, 1]} : vector<4x256xf32> to vector<1x256xf32>
    %6 = vector.broadcast %4 : vector<4x1xf32> to vector<4x256xf32>
    %7 = vector.broadcast %5 : vector<1x256xf32> to vector<4x256xf32>
    %8 = arith.mulf %6, %7 : vector<4x256xf32>
    %9 = vector.broadcast %0 : vector<4x1xf32> to vector<4x256xf32>
    %10 = arith.addf %9, %8 : vector<4x256xf32>
    %11 = vector.extract_strided_slice %1 {offsets = [0, 1], sizes = [4, 1], strides = [1, 1]} : vector<4x4xf32> to vector<4x1xf32>
    %12 = vector.extract_strided_slice %3 {offsets = [1, 0], sizes = [1, 256], strides = [1, 1]} : vector<4x256xf32> to vector<1x256xf32>
    %13 = vector.broadcast %11 : vector<4x1xf32> to vector<4x256xf32>
    %14 = vector.broadcast %12 : vector<1x256xf32> to vector<4x256xf32>
    %15 = arith.mulf %13, %14 : vector<4x256xf32>
    %16 = arith.addf %10, %15 : vector<4x256xf32>
    %17 = vector.extract_strided_slice %1 {offsets = [0, 2], sizes = [4, 1], strides = [1, 1]} : vector<4x4xf32> to vector<4x1xf32>
    %18 = vector.extract_strided_slice %3 {offsets = [2, 0], sizes = [1, 256], strides = [1, 1]} : vector<4x256xf32> to vector<1x256xf32>
    %19 = vector.broadcast %17 : vector<4x1xf32> to vector<4x256xf32>
    %20 = vector.broadcast %18 : vector<1x256xf32> to vector<4x256xf32>
    %21 = arith.mulf %19, %20 : vector<4x256xf32>
    %22 = arith.addf %16, %21 : vector<4x256xf32>
    %23 = vector.extract_strided_slice %1 {offsets = [0, 3], sizes = [4, 1], strides = [1, 1]} : vector<4x4xf32> to vector<4x1xf32>
    %24 = vector.extract_strided_slice %3 {offsets = [3, 0], sizes = [1, 256], strides = [1, 1]} : vector<4x256xf32> to vector<1x256xf32>
    %25 = vector.broadcast %23 : vector<4x1xf32> to vector<4x256xf32>
    %26 = vector.broadcast %24 : vector<1x256xf32> to vector<4x256xf32>
    %27 = arith.mulf %25, %26 : vector<4x256xf32>
    %28 = arith.addf %22, %27 : vector<4x256xf32>
    %cst = arith.constant 5.000000e-01 : f32
    %29 = vector.broadcast %cst : f32 to vector<4x256xf32>
    %30 = arith.mulf %3, %29 : vector<4x256xf32>
    %31 = math.tanh %30 : vector<4x256xf32>
    %cst_6 = arith.constant 1.000000e+00 : f32
    %32 = vector.broadcast %cst_6 : f32 to vector<4x256xf32>
    %33 = arith.addf %31, %32 : vector<4x256xf32>
    %cst_7 = arith.constant 5.000000e-01 : f32
    %34 = vector.broadcast %cst_7 : f32 to vector<4x256xf32>
    %35 = arith.mulf %34, %33 : vector<4x256xf32>
    %36 = arith.mulf %28, %35 : vector<4x256xf32>
    %c0_8 = arith.constant 0 : index
    %c0_9 = arith.constant 0 : index
    %c0_10 = arith.constant 0 : index
    %37 = vector.load %arg5[%c0_8, %c0_9, %c0_10] : memref<1x4x256xf32, #tpu.memory_space<vmem>>, vector<1x4x256xf32>
    %38 = vector.shape_cast %37 : vector<1x4x256xf32> to vector<4x256xf32>
    %39 = vector.shape_cast %36 : vector<4x256xf32> to vector<1x4x256xf32>
    tpu.vector_store %arg5[%c0_8, %c0_9, %c0_10], %39 {strides = array<i32>} : memref<1x4x256xf32, #tpu.memory_space<vmem>>, vector<1x4x256xf32>,
    return
  }
  func.func @transform_0(%arg0: i32, %arg1: i32) -> (i32, i32, i32) {
    %c0_i32 = arith.constant 0 : i32
    %c0_i32_0 = arith.constant 0 : i32
    return %arg0, %c0_i32, %arg1 : i32, i32, i32
  }
  func.func @transform_1(%arg0: i32, %arg1: i32) -> (i32, i32) {
    %c0_i32 = arith.constant 0 : i32
    %c0_i32_0 = arith.constant 0 : i32
    %c0_i32_1 = arith.constant 0 : i32
    return %c0_i32, %c0_i32_0 : i32, i32
  }
  func.func @transform_2(%arg0: i32, %arg1: i32) -> (i32, i32) {
    %c0_i32 = arith.constant 0 : i32
    %c0_i32_0 = arith.constant 0 : i32
    %c0_i32_1 = arith.constant 0 : i32
    return %c0_i32, %c0_i32_0 : i32, i32
  }
  func.func @transform_3(%arg0: i32, %arg1: i32) -> (i32, i32, i32) {
    %c0_i32 = arith.constant 0 : i32
    %c0_i32_0 = arith.constant 0 : i32
    return %arg0, %c0_i32, %arg1 : i32, i32, i32
  }
}

</mosaic_0001>

<bundles_post_ra>
// kernel: tpu_custom_call.1
= control target key start
LH: loop header
LB: loop body
LE: loop exit
PB: predicated region body
PF: predicated region fallthrough
CT: control target
= control target key end

     0   :  { %8 = vsyncpa [#allocation3], 0  ;;  %s755_s0 = inlined_call_operand.hbm [shape: f32[2,4,256], index: 0, kind: input, shape index: {}]   ;;  %s756_s1 = inlined_call_operand.vmem [shape: f32[4,4], index: 1, kind: input, shape index: {}]   ;;  %s757_s2 = inlined_call_operand.vmem [shape: f32[4,1], index: 2, kind: input, shape index: {}]   ;;  %s758_s3 = inlined_call_operand.hbm [shape: f32[2,4,256], index: 3, kind: output, shape index: {}]  }
   0x1   :  { %10 = vsyncpa [#allocation3 + $0x1], 0 }
   0x2   :  { %11 = vsyncpa [#allocation4], 0 }
   0x3   :  { %13 = vsyncpa [#allocation4 + $0x1], 0  ;;  %s625_s12 = smov 0   ;;  %s627_s13 = smov 0  }
   0x4   :  { %s629_s14 = smov 0   ;;  %s631_s15 = smov 0  }
   0x5   :  { %s633_s16 = smov 0   ;;  %s635_s17 = smov 0  }
   0x6 LB: > { %s397_s18 = sadd.s32 4294967295, %s599_s17   ;;  %s398_s19 = sadd.s32 4294967294, %s599_s17   ;;  %s599_s17 = sphi %s635_s17, %s19_s17   ;;  %s595_s16 = sphi %s633_s16, %s767_s16   ;;  %s591_s15 = sphi %s631_s15, %s766_s15   ;;  %s587_s14 = sphi %s629_s14, %s765_s14   ;;  %s583_s13 = sphi %s627_s13, %s764_s13   ;;  %s579_s12 = sphi %s625_s12, %s763_s12  }
   0x7   : > { %s31_s20 = sadd.s32 1, %s595_s16  ;;  %s40_s21 = sadd.s32 1, %s587_s14 }
   0x8   : > { %p33_p0 = scmp.ge.s32.totalorder %s31_s20, 2  ;;  %p47_p1 = scmp.ne.s32.totalorder %s587_s14, %s583_s13 }
   0x9   : > { %p48_p2 = scmp.eq.s32.totalorder %s599_s17, 0  ;;  %p53_p3 = scmp.ne.s32.totalorder %s583_s13, %s579_s12 }
   0xa   : > { %s769_s20 = smov (%p33_p0, %s31_s20), 0  ;;  %p54_p5 = scmp.eq.s32.totalorder %s397_s18, 0 }
   0xb   : > { %p666_p4 = por %p48_p2, %p47_p1  ;;  %s35_s23 = ssub.s32 %s595_s16, %s769_s20 }
   0xc   : > { %p121_p6 = scmp.eq.s32.totalorder %s397_s18, 1  ;;  %p38_p7 = scmp.eq.s32.totalorder %s35_s23, 0 }
   0xd   : > { %p672_p8 = por %p54_p5, %p53_p3  ;;  %p127_p10 = scmp.eq.s32.totalorder %s398_s19, 1 }
   0xe   : > { %p676_p9 = por %p121_p6, %p47_p1  ;;  %p400_p12 = scmp.ge.s32.totalorder %s599_s17, 2 }
   0xf   : > { %s681_s26 = scalar_select %p38_p7, %s587_s14, %s40_s21  }
  0x10   : > { %p683_p11 = por %p127_p10, %p53_p3  ;;  %p426_p13 = scmp.lt.s32.totalorder %s599_s17, 2 }
  0x11   : > { %s153_s28 = sand.u32 1, %s587_s14   ;;  %s412_s30 = sshll.u32 %s595_s16, 3 }
  0x12   : > { %s401_s29 = sshll.u32 %s153_s28, 3  ;;  %s164_s6 = scalar_lea.hbm %s755_s0, %s412_s30 }
  0x13   : > { %s157_s7 = scalar_lea.vmem [#allocation2], %s401_s29  ;;  %s166_s9 = sshll.u32 %s164_s6, 4  ;;  %s167_s9 = int_to_ptr.hbm [resolvable:$true] %s166_s9 }
  0x14   : > { %s168_s8 = sshll.u32 %s157_s7, 4  ;;  %p419_p0 = pnand %p426_p13, %p666_p4  ;;  %s169_s8 = int_to_ptr.vmem [resolvable:$true] %s168_s8 }
  0x15   : > { %p404_p1 = scmp.ge.s32.totalorder %s599_s17, 1  ;;  %p173_p2 = scmp.lt.s32.totalorder %s599_s17, 3 }
  0x16   : > { %s154_s10 = scalar_lea.sflag [#allocation3], %s153_s28 }
  0x17   : > { %421 = dma.hbm_to_vmem [thread:$0]  (!%p419_p0), %s167_s9, 128, %s169_s8, %s154_s10  }
  0x18   : > { %p174_p3 = pnand %p404_p1, %p173_p2 }
  0x19   : > { %s699_s11 = sand.u32 (!%p174_p3), 1, %s583_s13  }
  0x1a   : > { %177 = sbr.rel (%p174_p3) target bundleno = 173 (0xad), region = 32  ;;  %s405_s18 = sshll.u32 (!%p174_p3), %s699_s11, 3 }
  0x1b   : > { %s180_s19 = scalar_lea.sflag (!%p174_p3), [#allocation3], %s699_s11  ;;  %s183_s21 = scalar_lea.vmem (!%p174_p3), [#allocation2], %s405_s18 }
  0x1f   : > { %570 = dma.done.wait (%p672_p8), %s180_s19, 128  }
  0x20   : > { %572 = vsyncadd (%p672_p8), %s180_s19, 4294967168  ;;  %v601_v0 = vmov 0   ;;  %v602_v1 = vmov 1   ;;  %v603_v2 = vmov 3   ;;  %v211_v3 = vld [vmem:[%s183_s21] sm:$0xff]  ;;  %v604_v8 = vmov 2  }
  0x21   : > { %480 = vset.pattern.permute.xlu0 %v601_v0  ;;  %481 = vset.pattern.permute.xlu1 %v602_v1  ;;  %v210_v4 = vld [vmem:[%s756_s1] sm:$0xf]  ;;  %v275_v5 = vmul.f32 0.5, %v211_v3  ;;  %v218_v11 = vperm.slane %v211_v3, 0  ;;  %v219_v12 = vperm.slane %v211_v3, 4  ;;  %v237_v15 = vperm.slane %v211_v3, 1 }
  0x22   : > { %483 = vset.pattern.permute.xlu2 %v603_v2  ;;  %214 = vperm.xlu0 %480, %v210_v4   ;;  %v209_v6 = vld [vmem:[%s757_s2] sm:$0xf]  ;;  %v238_v16 = vperm.slane %v211_v3, 5  ;;  %v251_v17 = vperm.slane %v211_v3, 2  ;;  %v252_v18 = vperm.slane %v211_v3, 6  ;;  %v265_v21 = vperm.slane %v211_v3, 3 }
  0x23   : > { %234 = vperm.xlu1 %481, %v210_v4   ;;  %262 = vperm.xlu2 %483, %v210_v4   ;;  %485 = vtanh.f32 %v275_v5  ;;  %v222_v19 = vperm.slane %v218_v11, 0  ;;  %v223_v20 = vperm.slane %v219_v12, 0  ;;  %v266_v22 = vperm.slane %v211_v3, 7  ;;  %s413_s24 = sshll.u32 %s591_s15, 3  ;;  %s206_s6 = scalar_lea.vmem [#allocation5], %s405_s18 }
  0x24   : > { %v241_v23 = vperm.slane %v237_v15, 1  ;;  %v242_v24 = vperm.slane %v238_v16, 1  ;;  %v255_v25 = vperm.slane %v251_v17, 2  ;;  %v256_v26 = vperm.slane %v252_v18, 2  ;;  %s308_s5 = scalar_lea.hbm %s758_s3, %s413_s24  ;;  %s310_s7 = sshll.u32 %s206_s6, 4  ;;  %s311_s7 = int_to_ptr.vmem [resolvable:$true] %s310_s7 }
  0x25   : > { %v269_v29 = vperm.slane %v265_v21, 3  ;;  %v270_v30 = vperm.slane %v266_v22, 3  ;;  %s312_s8 = sshll.u32 %s308_s5, 4  ;;  %vm290_vm0 = vcmask 1043456   ;;  %s295_s15 = scalar_lea.sflag [#allocation4], %s699_s11  ;;  %s313_s8 = int_to_ptr.hbm [resolvable:$true] %s312_s8 }
  0x26   : > { %s531_s9 = sshra.s32 %s313_s8, 4  ;;  %s537_s18 = scalar_lea.hbm %s758_s3, 16  ;;  %s532_s9 = int_to_ptr.hbm [resolvable:$true] %s531_s9 }
  0x27   : > { %s533_s10 = scalar_lea.hbm %s532_s9, 8  ;;  %p538_p7 = scmp.lt.s32.totalorder %s532_s9, %s758_s3 }
  0x28   : > { %p534_p4 = scmp.ne.s32.totalorder %s532_s9, %s533_s10  ;;  %p539_p8 = scmp.lt.s32.totalorder %s537_s18, %s533_s10 }
  0x29   : > { %v486_v7 = vpop.eup %485 }
  0x2a   : > { %228 = vperm.xlu0 %480, %v209_v6   ;;  %v277_v9 = vadd.f32 1.0, %v486_v7  ;;  %p535_p5 = pnand %p534_p4, %p676_p9  ;;  %p540_p10 = por %p539_p8, %p538_p7 }
  0x2b   : > { %482 = vset.pattern.permute.xlu1 %v604_v8 }
  0x2c   : > { %248 = vperm.xlu1 %482, %v210_v4   ;;  %v278_v10 = vmul.f32 0.5, %v277_v9  ;;  %p536_p6 = pneg %p535_p5 }
  0x2e   : > { %280 = vst [vmem:[#allocation1] ss:$2 sm:$0xff] %v278_v10  ;;  %p541_p13 = pnand %p540_p10, %p536_p6 }
  0x32   : > { %484 = vset.pattern.permute.xlu0 %v603_v2 }
  0x35   : > { %v282_v46 = vld.sshfl [vmem:[#allocation1 + $0x8] sm:$0xff pattern:$0x75316420]  ;;  %v281_v49 = vld.sshfl [vmem:[#allocation1] sm:$0xff pattern:$0x75316420] }
  0x7d   : > { %v263_v32 = vpop.permute.xlu2 %262 }
  0x7e   : > { %v271_v42 = vmul.f32 %v269_v29, %v263_v32  ;;  %v272_v43 = vmul.f32 %v270_v30, %v263_v32 }
  0x94   : > { %v215_v13 = vpop.permute.xlu0 %214 }
  0x95   : > { %v235_v14 = vpop.permute.xlu1 %234  ;;  %v224_v27 = vmul.f32 %v222_v19, %v215_v13  ;;  %v225_v28 = vmul.f32 %v223_v20, %v215_v13 }
  0x96   : > { %v243_v33 = vmul.f32 %v241_v23, %v235_v14  ;;  %v244_v34 = vmul.f32 %v242_v24, %v235_v14 }
  0x9c   : > { %v229_v31 = vpop.permute.xlu0 %228 }
  0x9d   : > { %v231_v35 = vadd.f32 %v229_v31, %v224_v27  ;;  %v232_v36 = vadd.f32 %v229_v31, %v225_v28 }
  0x9e   : > { %v249_v37 = vpop.permute.xlu1 %248 }
  0x9f   : > { %v257_v38 = vmul.f32 %v255_v25, %v249_v37  ;;  %v258_v39 = vmul.f32 %v256_v26, %v249_v37  ;;  %v245_v40 = vadd.f32 %v243_v33, %v231_v35  ;;  %v246_v41 = vadd.f32 %v244_v34, %v232_v36 }
  0xa1   : > { %v259_v44 = vadd.f32 %v257_v38, %v245_v40  ;;  %v260_v45 = vadd.f32 %v258_v39, %v246_v41 }
  0xa3   : > { %v273_v47 = vadd.f32 %v271_v42, %v259_v44  ;;  %v274_v48 = vadd.f32 %v272_v43, %v260_v45 }
  0xa5   : > { %v286_v50 = vmul.f32 %v282_v46, %v274_v48  ;;  %v285_v51 = vmul.f32 %v281_v49, %v273_v47 }
  0xa7   : > { %v289_v52 = vrot.slane %v286_v50, 4 }
  0xa9   : > { %v291_v53 = vsel %vm290_vm0, %v285_v51, %v289_v52 }
  0xaa   : > { %293 = vst [vmem:[%s206_s6] sm:$0xff] %v291_v53 }
  0xab   : > { %544 = shalt.err (!%p541_p13)
}
  0xac   : > { %416 = dma.vmem_to_hbm [thread:$0]  (%p676_p9), %s311_s7, 128, %s313_s8, %s295_s15  }
  0xad PF: > { %s324_s11 = sand.u32 1, %s579_s12   ;;  %p423_p0 = pnand %p400_p12, %p683_p11 }
  0xae   : > { %s325_s28 = scalar_lea.sflag [#allocation4], %s324_s11 }
  0xaf   : > { %p424_p1 = pneg %p423_p0 }
  0xb1   : > { %574 = dma.done.wait (%p424_p1), %s325_s28, 128  }
  0xb2   : > { %576 = vsyncadd (%p424_p1), %s325_s28, 4294967168  ;;  %s19_s17 = sadd.s32 1, %s599_s17   ;;  %s763_s12 = smov %s583_s13 }
  0xb3   : > { %p16_p2 = scmp.ge.s32.totalorder %s19_s17, 4   ;;  %s764_s13 = smov %s587_s14 }
  0xb4   : > { %s765_s14 = smov %s681_s26  ;;  %s766_s15 = smov %s595_s16 }
  0xb5   : > { %s767_s16 = smov %s769_s20  ;;  %18 = sbr.rel (!%p16_p2) target bundleno = 6 (0x6), region = 77 }
  0xba   :  { %331 = vsyncpa [#allocation3], 1 }
  0xbb   :  { %333 = vsyncpa [#allocation3 + $0x1], 1 }
  0xbc   :  { %334 = vsyncpa [#allocation4], 1 }
  0xbd   :  { %336 = vsyncpa [#allocation4 + $0x1], 1 }

</bundles_post_ra>
